<compile_context>
chip_gen: v7x
topology: tpu7x:2x2x1
jax: 0.10.0
libtpu: 0.0.40
codegen_flags: <defaults>
</compile_context>

<pallas_src>
import jax
import jax.numpy as jnp
from jax.experimental import pallas as pl
from jax.experimental.pallas import tpu as pltpu

_LANE = 128
_SUB = 8


def _align(n, m):
    return ((n + m - 1) // m) * m


def _mish(x):
    # mish(x) = x * tanh(softplus(x)) = x * ((1+e^x)^2 - 1) / ((1+e^x)^2 + 1)
    # Single exp + approx reciprocal (one Newton step); clamp exp arg to avoid
    # overflow and fall back to identity for large x (tanh(softplus(x)) == 1 in f32).
    e = jnp.exp(jnp.minimum(x, 20.0))
    num = e * (e + 2.0)            # (1 + e)^2 - 1, cancellation-free
    den = num + 2.0                # (1 + e)^2 + 1
    r = pl.reciprocal(den, approx=True)
    r = r * (2.0 - den * r)        # one Newton step -> ~f32 accuracy (VPU-only)
    return jnp.where(x > 20.0, x, x * num * r)


def _make_kernel(lay):
    t_dim, t2 = lay["t_dim"], lay["t2"]
    hid, feat_pad, out_pad = lay["hidden"], lay["feat_pad"], lay["out_pad"]
    R = lay["rows"]   # static Python row offsets into the param slab

    def kernel(feat_ref, p_ref, out_ref):
        def dot(a, b):
            return jnp.dot(a, b, preferred_element_type=jnp.float32)

        feat = feat_ref[...]                                   # (B, feat_pad)

        # ---- time MLP: Linear(t_dim, 2*t_dim) -> Mish -> Linear(2*t_dim, t_dim) ----
        # First Linear consumes the combined input (only the sin/cos rows of the
        # packed weight are non-zero), so cat([sin, cos]) never materializes.
        th = (dot(feat, p_ref[R["wt1f"]:R["wt1f"] + feat_pad, :t2])
              + p_ref[R["bt1"]:R["bt1"] + 1, :t2])
        th = _mish(th)
        t = (dot(th, p_ref[R["wt2"]:R["wt2"] + t2, :t_dim])
             + p_ref[R["bt2"]:R["bt2"] + 1, :t_dim])           # (B, t_dim)

        # ---- mid layers: cat([x, t, state]) folded into two partial matmuls ----
        h = (dot(feat, p_ref[R["w1f"]:R["w1f"] + feat_pad, :hid])
             + dot(t, p_ref[R["w1t"]:R["w1t"] + t_dim, :hid])
             + p_ref[R["b1"]:R["b1"] + 1, :hid])
        h = _mish(h)
        h = _mish(dot(h, p_ref[R["w2"]:R["w2"] + hid, :hid])
                  + p_ref[R["b2"]:R["b2"] + 1, :hid])
        h = _mish(dot(h, p_ref[R["w3"]:R["w3"] + hid, :hid])
                  + p_ref[R["b3"]:R["b3"] + 1, :hid])

        # ---- final layer: lane-dense (B, 128) store; wrapper slices to action_dim ----
        out_ref[...] = (dot(h, p_ref[R["w4"]:R["w4"] + hid, :out_pad])
                        + p_ref[R["b4"]:R["b4"] + 1, :out_pad]
                        ).astype(out_ref.dtype)

    return kernel


def mlp_forward(x, time, state, packed):
    """x: (B, action_dim), time: (B,), state: (B, state_dim) -> (B, action_dim)."""
    lay = packed["layout"]
    slab = packed["slab"]
    batch, action_dim = x.shape
    feat_dim, feat_pad = lay["feat_dim"], lay["feat_pad"]

    # Single per-batch input: [x | state | sin(ang) | cos(ang) | zero pad].
    ang = time.astype(jnp.float32)[:, None] * packed["freqs"]          # (B, t_dim//2)
    feat = jnp.concatenate(
        [x.astype(jnp.float32), state.astype(jnp.float32),
         jnp.sin(ang), jnp.cos(ang)], axis=1)                          # (B, feat_dim)
    feat = jnp.pad(feat, ((0, 0), (0, feat_pad - feat_dim)))

    vmem = pl.BlockSpec(memory_space=pltpu.MemorySpace.VMEM)
    out = pl.pallas_call(
        _make_kernel(lay),
        out_shape=jax.ShapeDtypeStruct((batch, lay["out_pad"]), jnp.float32),
        in_specs=[vmem, vmem],
        out_specs=vmem,
    )(feat, slab)
    return out[:, :action_dim]


def init_mlp_params(key, state_dim, action_dim, t_dim=4, hidden_dim=32):
    """nn.Linear-style init (U[-1/sqrt(fan_in), +1/sqrt(fan_in)]), weights as (in, out).

    All parameters are packed into one 128-lane f32 slab (one DMA at call time).
    Weights consuming a torch.cat input are stored zero-row-padded over the packed
    feature layout so the kernel never concatenates.
    """
    half = t_dim // 2
    t2 = 2 * t_dim
    xs_dim = action_dim + state_dim
    feat_dim = xs_dim + t_dim                 # [x | state | sin | cos]
    feat_pad = _align(feat_dim, _SUB)
    out_pad = _align(action_dim, _LANE)

    freqs = jnp.exp(-jnp.arange(half, dtype=jnp.float32)
                    * (jnp.log(10000.0) / (half - 1)))[None, :]

    def linear(k, fan_in, fan_out):
        kw, kb = jax.random.split(k)
        bound = 1.0 / (fan_in ** 0.5)
        w = jax.random.uniform(kw, (fan_in, fan_out), jnp.float32, -bound, bound)
        b = jax.random.uniform(kb, (1, fan_out), jnp.float32, -bound, bound)
        return w, b

    keys = jax.random.split(key, 6)

    wt1, bt1 = linear(keys[0], t_dim, t2)
    wt2, bt2 = linear(keys[1], t2, t_dim)

    input_dim = action_dim + t_dim + state_dim          # torch cat([x, t, state])
    w1, b1 = linear(keys[2], input_dim, hidden_dim)
    w1_x = w1[:action_dim]
    w1_t = w1[action_dim:action_dim + t_dim]
    w1_s = w1[action_dim + t_dim:]

    w2, b2 = linear(keys[3], hidden_dim, hidden_dim)
    w3, b3 = linear(keys[4], hidden_dim, hidden_dim)
    w4, b4 = linear(keys[5], hidden_dim, action_dim)

    # Time-MLP first Linear over the combined feature layout (sin/cos rows only).
    wt1f = jnp.zeros((feat_pad, t2), jnp.float32)
    wt1f = wt1f.at[xs_dim:xs_dim + t_dim].set(wt1)
    # Mid-layer first Linear x/state part over the combined feature layout.
    w1f = jnp.zeros((feat_pad, hidden_dim), jnp.float32)
    w1f = w1f.at[:action_dim].set(w1_x)
    w1f = w1f.at[action_dim:action_dim + state_dim].set(w1_s)
    # Lane-dense final layer (zero columns past action_dim).
    w4p = jnp.pad(w4, ((0, 0), (0, out_pad - action_dim)))
    b4p = jnp.pad(b4, ((0, 0), (0, out_pad - action_dim)))

    blocks = [
        ("wt1f", wt1f), ("bt1", bt1), ("wt2", wt2), ("bt2", bt2),
        ("w1f", w1f), ("w1t", w1_t), ("b1", b1),
        ("w2", w2), ("b2", b2), ("w3", w3), ("b3", b3),
        ("w4", w4p), ("b4", b4p),
    ]
    rows, off = {}, 0
    for name, arr in blocks:
        rows[name] = off
        off += _align(arr.shape[0], _SUB)
    total_rows = _align(off, _SUB)

    slab = jnp.zeros((total_rows, _LANE), jnp.float32)
    for name, arr in blocks:
        r, c = arr.shape
        slab = slab.at[rows[name]:rows[name] + r, :c].set(arr)

    layout = dict(t_dim=t_dim, t2=t2, hidden=hidden_dim,
                  feat_dim=feat_dim, feat_pad=feat_pad, out_pad=out_pad,
                  action_dim=action_dim, state_dim=state_dim, rows=rows)
    return {
        "slab": slab, "layout": layout, "freqs": freqs,
        # unpacked copies for the pure-JAX reference
        "ref": dict(freqs=freqs, wt1=wt1, bt1=bt1, wt2=wt2, bt2=bt2,
                    w1=w1, b1=b1, w2=w2, b2=b2, w3=w3, b3=b3, w4=w4, b4=b4),
    }


def _reference_forward(x, time, state, ref):
    """Pure-JAX reference mirroring the PyTorch module exactly."""
    def mish(h):
        return h * jnp.tanh(jax.nn.softplus(h))

    ang = time.astype(jnp.float32)[:, None] * ref["freqs"]
    emb = jnp.concatenate([jnp.sin(ang), jnp.cos(ang)], axis=-1)
    th = mish(emb @ ref["wt1"] + ref["bt1"])
    t = th @ ref["wt2"] + ref["bt2"]
    h = jnp.concatenate([x, t, state], axis=-1)
    h = mish(h @ ref["w1"] + ref["b1"])
    h = mish(h @ ref["w2"] + ref["b2"])
    h = mish(h @ ref["w3"] + ref["b3"])
    return h @ ref["w4"] + ref["b4"]


if __name__ == "__main__":
    state_dim, action_dim, t_dim, hidden_dim, batch = 17, 6, 4, 32, 8

    key = jax.random.PRNGKey(0)
    kp, kx, kt, ks = jax.random.split(key, 4)
    packed = init_mlp_params(kp, state_dim, action_dim, t_dim, hidden_dim)
    x = jax.random.normal(kx, (batch, action_dim), jnp.float32)
    time = jax.random.uniform(kt, (batch,), jnp.float32, 0.0, 10.0)
    state = jax.random.normal(ks, (batch, state_dim), jnp.float32)

    out = mlp_forward(x, time, state, packed)
    jax.block_until_ready(out)

    ref = _reference_forward(x, time, state, packed["ref"])
    assert out.shape == (batch, action_dim)
    max_err = float(jnp.max(jnp.abs(out - ref)))
    assert jnp.allclose(out, ref, atol=1e-4, rtol=1e-4), f"max_err={max_err}"

    print("KERNEL_OK")
</pallas_src>

<mosaic_0001>
module attributes {stable_mosaic.version = 11 : i64} {
  func.func @kernel(%arg0: memref<8x32xf32, #tpu.memory_space<vmem>>, %arg1: memref<224x128xf32, #tpu.memory_space<vmem>>, %arg2: memref<8x128xf32, #tpu.memory_space<vmem>>) attributes {dimension_semantics = [], scalar_prefetch = 0 : i64, scratch_operands = 0 : i64, tpu.core_type = #tpu.core_type<tc>} {
    %c0 = arith.constant 0 : index
    %c0_0 = arith.constant 0 : index
    %0 = vector.load %arg0[%c0, %c0_0] : memref<8x32xf32, #tpu.memory_space<vmem>>, vector<8x32xf32>
    %c0_1 = arith.constant 0 : index
    %c0_2 = arith.constant 0 : index
    %1 = vector.load %arg1[%c0_1, %c0_2] : memref<224x128xf32, #tpu.memory_space<vmem>>, vector<32x8xf32>
    %cst = arith.constant dense<0.000000e+00> : vector<8x8xf32>
    %2 = tpu.matmul %0, %1, %cst {dimension_numbers = #tpu.dot_dimension_numbers<[1], [0], [0], [1], [0, 0, 1, 1], [], []>} : vector<8x32xf32>, vector<32x8xf32>, vector<8x8xf32> -> vector<8x8xf32>
    %c32 = arith.constant 32 : index
    %c0_3 = arith.constant 0 : index
    %3 = vector.load %arg1[%c32, %c0_3] : memref<224x128xf32, #tpu.memory_space<vmem>>, vector<1x8xf32>
    %4 = vector.broadcast %3 : vector<1x8xf32> to vector<8x8xf32>
    %5 = arith.addf %2, %4 : vector<8x8xf32>
    %cst_4 = arith.constant 2.000000e+01 : f32
    %6 = vector.broadcast %cst_4 : f32 to vector<8x8xf32>
    %7 = arith.minimumf %5, %6 : vector<8x8xf32>
    %8 = math.exp %7 : vector<8x8xf32>
    %cst_5 = arith.constant 2.000000e+00 : f32
    %9 = vector.broadcast %cst_5 : f32 to vector<8x8xf32>
    %10 = arith.addf %8, %9 : vector<8x8xf32>
    %11 = arith.mulf %8, %10 : vector<8x8xf32>
    %cst_6 = arith.constant 2.000000e+00 : f32
    %12 = vector.broadcast %cst_6 : f32 to vector<8x8xf32>
    %13 = arith.addf %11, %12 : vector<8x8xf32>
    %14 = tpu.reciprocal %13 {approx = true} : vector<8x8xf32> -> vector<8x8xf32>
    %15 = arith.mulf %13, %14 : vector<8x8xf32>
    %cst_7 = arith.constant 2.000000e+00 : f32
    %16 = vector.broadcast %cst_7 : f32 to vector<8x8xf32>
    %17 = arith.subf %16, %15 : vector<8x8xf32>
    %18 = arith.mulf %14, %17 : vector<8x8xf32>
    %cst_8 = arith.constant 2.000000e+01 : f32
    %19 = vector.broadcast %cst_8 : f32 to vector<8x8xf32>
    %20 = arith.cmpf ogt, %5, %19 : vector<8x8xf32>
    %21 = arith.mulf %5, %11 : vector<8x8xf32>
    %22 = arith.mulf %21, %18 : vector<8x8xf32>
    %23 = arith.select %20, %5, %22 : vector<8x8xi1>, vector<8x8xf32>
    %c40 = arith.constant 40 : index
    %c0_9 = arith.constant 0 : index
    %24 = vector.load %arg1[%c40, %c0_9] : memref<224x128xf32, #tpu.memory_space<vmem>>, vector<8x4xf32>
    %cst_10 = arith.constant dense<0.000000e+00> : vector<8x4xf32>
    %25 = tpu.matmul %23, %24, %cst_10 {dimension_numbers = #tpu.dot_dimension_numbers<[1], [0], [0], [1], [0, 0, 1, 1], [], []>} : vector<8x8xf32>, vector<8x4xf32>, vector<8x4xf32> -> vector<8x4xf32>
    %c48 = arith.constant 48 : index
    %c0_11 = arith.constant 0 : index
    %26 = vector.load %arg1[%c48, %c0_11] : memref<224x128xf32, #tpu.memory_space<vmem>>, vector<1x4xf32>
    %27 = vector.broadcast %26 : vector<1x4xf32> to vector<8x4xf32>
    %28 = arith.addf %25, %27 : vector<8x4xf32>
    %c56 = arith.constant 56 : index
    %c0_12 = arith.constant 0 : index
    %29 = vector.load %arg1[%c56, %c0_12] : memref<224x128xf32, #tpu.memory_space<vmem>>, vector<32x32xf32>
    %cst_13 = arith.constant dense<0.000000e+00> : vector<8x32xf32>
    %30 = tpu.matmul %0, %29, %cst_13 {dimension_numbers = #tpu.dot_dimension_numbers<[1], [0], [0], [1], [0, 0, 1, 1], [], []>} : vector<8x32xf32>, vector<32x32xf32>, vector<8x32xf32> -> vector<8x32xf32>
    %c88 = arith.constant 88 : index
    %c0_14 = arith.constant 0 : index
    %31 = vector.load %arg1[%c88, %c0_14] : memref<224x128xf32, #tpu.memory_space<vmem>>, vector<4x32xf32>
    %cst_15 = arith.constant dense<0.000000e+00> : vector<8x32xf32>
    %32 = tpu.matmul %28, %31, %cst_15 {dimension_numbers = #tpu.dot_dimension_numbers<[1], [0], [0], [1], [0, 0, 1, 1], [], []>} : vector<8x4xf32>, vector<4x32xf32>, vector<8x32xf32> -> vector<8x32xf32>
    %33 = arith.addf %30, %32 : vector<8x32xf32>
    %c96 = arith.constant 96 : index
    %c0_16 = arith.constant 0 : index
    %34 = vector.load %arg1[%c96, %c0_16] : memref<224x128xf32, #tpu.memory_space<vmem>>, vector<1x32xf32>
    %35 = vector.broadcast %34 : vector<1x32xf32> to vector<8x32xf32>
    %36 = arith.addf %33, %35 : vector<8x32xf32>
    %cst_17 = arith.constant 2.000000e+01 : f32
    %37 = vector.broadcast %cst_17 : f32 to vector<8x32xf32>
    %38 = arith.minimumf %36, %37 : vector<8x32xf32>
    %39 = math.exp %38 : vector<8x32xf32>
    %cst_18 = arith.constant 2.000000e+00 : f32
    %40 = vector.broadcast %cst_18 : f32 to vector<8x32xf32>
    %41 = arith.addf %39, %40 : vector<8x32xf32>
    %42 = arith.mulf %39, %41 : vector<8x32xf32>
    %cst_19 = arith.constant 2.000000e+00 : f32
    %43 = vector.broadcast %cst_19 : f32 to vector<8x32xf32>
    %44 = arith.addf %42, %43 : vector<8x32xf32>
    %45 = tpu.reciprocal %44 {approx = true} : vector<8x32xf32> -> vector<8x32xf32>
    %46 = arith.mulf %44, %45 : vector<8x32xf32>
    %cst_20 = arith.constant 2.000000e+00 : f32
    %47 = vector.broadcast %cst_20 : f32 to vector<8x32xf32>
    %48 = arith.subf %47, %46 : vector<8x32xf32>
    %49 = arith.mulf %45, %48 : vector<8x32xf32>
    %cst_21 = arith.constant 2.000000e+01 : f32
    %50 = vector.broadcast %cst_21 : f32 to vector<8x32xf32>
    %51 = arith.cmpf ogt, %36, %50 : vector<8x32xf32>
    %52 = arith.mulf %36, %42 : vector<8x32xf32>
    %53 = arith.mulf %52, %49 : vector<8x32xf32>
    %54 = arith.select %51, %36, %53 : vector<8x32xi1>, vector<8x32xf32>
    %c104 = arith.constant 104 : index
    %c0_22 = arith.constant 0 : index
    %55 = vector.load %arg1[%c104, %c0_22] : memref<224x128xf32, #tpu.memory_space<vmem>>, vector<32x32xf32>
    %cst_23 = arith.constant dense<0.000000e+00> : vector<8x32xf32>
    %56 = tpu.matmul %54, %55, %cst_23 {dimension_numbers = #tpu.dot_dimension_numbers<[1], [0], [0], [1], [0, 0, 1, 1], [], []>} : vector<8x32xf32>, vector<32x32xf32>, vector<8x32xf32> -> vector<8x32xf32>
    %c136 = arith.constant 136 : index
    %c0_24 = arith.constant 0 : index
    %57 = vector.load %arg1[%c136, %c0_24] : memref<224x128xf32, #tpu.memory_space<vmem>>, vector<1x32xf32>
    %58 = vector.broadcast %57 : vector<1x32xf32> to vector<8x32xf32>
    %59 = arith.addf %56, %58 : vector<8x32xf32>
    %cst_25 = arith.constant 2.000000e+01 : f32
    %60 = vector.broadcast %cst_25 : f32 to vector<8x32xf32>
    %61 = arith.minimumf %59, %60 : vector<8x32xf32>
    %62 = math.exp %61 : vector<8x32xf32>
    %cst_26 = arith.constant 2.000000e+00 : f32
    %63 = vector.broadcast %cst_26 : f32 to vector<8x32xf32>
    %64 = arith.addf %62, %63 : vector<8x32xf32>
    %65 = arith.mulf %62, %64 : vector<8x32xf32>
    %cst_27 = arith.constant 2.000000e+00 : f32
    %66 = vector.broadcast %cst_27 : f32 to vector<8x32xf32>
    %67 = arith.addf %65, %66 : vector<8x32xf32>
    %68 = tpu.reciprocal %67 {approx = true} : vector<8x32xf32> -> vector<8x32xf32>
    %69 = arith.mulf %67, %68 : vector<8x32xf32>
    %cst_28 = arith.constant 2.000000e+00 : f32
    %70 = vector.broadcast %cst_28 : f32 to vector<8x32xf32>
    %71 = arith.subf %70, %69 : vector<8x32xf32>
    %72 = arith.mulf %68, %71 : vector<8x32xf32>
    %cst_29 = arith.constant 2.000000e+01 : f32
    %73 = vector.broadcast %cst_29 : f32 to vector<8x32xf32>
    %74 = arith.cmpf ogt, %59, %73 : vector<8x32xf32>
    %75 = arith.mulf %59, %65 : vector<8x32xf32>
    %76 = arith.mulf %75, %72 : vector<8x32xf32>
    %77 = arith.select %74, %59, %76 : vector<8x32xi1>, vector<8x32xf32>
    %c144 = arith.constant 144 : index
    %c0_30 = arith.constant 0 : index
    %78 = vector.load %arg1[%c144, %c0_30] : memref<224x128xf32, #tpu.memory_space<vmem>>, vector<32x32xf32>
    %cst_31 = arith.constant dense<0.000000e+00> : vector<8x32xf32>
    %79 = tpu.matmul %77, %78, %cst_31 {dimension_numbers = #tpu.dot_dimension_numbers<[1], [0], [0], [1], [0, 0, 1, 1], [], []>} : vector<8x32xf32>, vector<32x32xf32>, vector<8x32xf32> -> vector<8x32xf32>
    %c176 = arith.constant 176 : index
    %c0_32 = arith.constant 0 : index
    %80 = vector.load %arg1[%c176, %c0_32] : memref<224x128xf32, #tpu.memory_space<vmem>>, vector<1x32xf32>
    %81 = vector.broadcast %80 : vector<1x32xf32> to vector<8x32xf32>
    %82 = arith.addf %79, %81 : vector<8x32xf32>
    %cst_33 = arith.constant 2.000000e+01 : f32
    %83 = vector.broadcast %cst_33 : f32 to vector<8x32xf32>
    %84 = arith.minimumf %82, %83 : vector<8x32xf32>
    %85 = math.exp %84 : vector<8x32xf32>
    %cst_34 = arith.constant 2.000000e+00 : f32
    %86 = vector.broadcast %cst_34 : f32 to vector<8x32xf32>
    %87 = arith.addf %85, %86 : vector<8x32xf32>
    %88 = arith.mulf %85, %87 : vector<8x32xf32>
    %cst_35 = arith.constant 2.000000e+00 : f32
    %89 = vector.broadcast %cst_35 : f32 to vector<8x32xf32>
    %90 = arith.addf %88, %89 : vector<8x32xf32>
    %91 = tpu.reciprocal %90 {approx = true} : vector<8x32xf32> -> vector<8x32xf32>
    %92 = arith.mulf %90, %91 : vector<8x32xf32>
    %cst_36 = arith.constant 2.000000e+00 : f32
    %93 = vector.broadcast %cst_36 : f32 to vector<8x32xf32>
    %94 = arith.subf %93, %92 : vector<8x32xf32>
    %95 = arith.mulf %91, %94 : vector<8x32xf32>
    %cst_37 = arith.constant 2.000000e+01 : f32
    %96 = vector.broadcast %cst_37 : f32 to vector<8x32xf32>
    %97 = arith.cmpf ogt, %82, %96 : vector<8x32xf32>
    %98 = arith.mulf %82, %88 : vector<8x32xf32>
    %99 = arith.mulf %98, %95 : vector<8x32xf32>
    %100 = arith.select %97, %82, %99 : vector<8x32xi1>, vector<8x32xf32>
    %c184 = arith.constant 184 : index
    %c0_38 = arith.constant 0 : index
    %101 = vector.load %arg1[%c184, %c0_38] : memref<224x128xf32, #tpu.memory_space<vmem>>, vector<32x128xf32>
    %cst_39 = arith.constant dense<0.000000e+00> : vector<8x128xf32>
    %102 = tpu.matmul %100, %101, %cst_39 {dimension_numbers = #tpu.dot_dimension_numbers<[1], [0], [0], [1], [0, 0, 1, 1], [], []>} : vector<8x32xf32>, vector<32x128xf32>, vector<8x128xf32> -> vector<8x128xf32>
    %c216 = arith.constant 216 : index
    %c0_40 = arith.constant 0 : index
    %103 = vector.load %arg1[%c216, %c0_40] : memref<224x128xf32, #tpu.memory_space<vmem>>, vector<1x128xf32>
    %104 = vector.broadcast %103 : vector<1x128xf32> to vector<8x128xf32>
    %105 = arith.addf %102, %104 : vector<8x128xf32>
    %c0_41 = arith.constant 0 : index
    %c0_42 = arith.constant 0 : index
    %106 = vector.load %arg2[%c0_41, %c0_42] : memref<8x128xf32, #tpu.memory_space<vmem>>, vector<8x128xf32>
    tpu.vector_store %arg2[%c0_41, %c0_42], %105 {strides = array<i32>} : memref<8x128xf32, #tpu.memory_space<vmem>>, vector<8x128xf32>,
    return
  }
}

</mosaic_0001>

<bundles_post_ra>
// kernel: tpu_custom_call.1
= control target key start
LH: loop header
LB: loop body
LE: loop exit
PB: predicated region body
PF: predicated region fallthrough
CT: control target
= control target key end

     0   :  { %7 = vsyncpa [#allocation3], 0  ;;  %s1011_s0 = inlined_call_operand.hbm [shape: f32[8,32], index: 0, kind: input, shape index: {}]   ;;  %s1012_s1 = inlined_call_operand.hbm [shape: f32[224,128], index: 1, kind: input, shape index: {}]   ;;  %s1013_s2 = inlined_call_operand.hbm [shape: f32[8,128], index: 2, kind: output, shape index: {}]  }
   0x1   :  { %8 = vsyncpa [#allocation6], 0 }
   0x2   :  { %9 = vsyncpa [#allocation4], 0  ;;  %s914_s9 = smov [#allocation2]   ;;  %s915_s11 = smov [#allocation5]  }
   0x3   :  { %s16_s10 = sshll.u32 %s914_s9, 4  ;;  %s25_s12 = sshll.u32 %s915_s11, 4  ;;  %s17_s10 = int_to_ptr.vmem [resolvable:$true] %s16_s10  ;;  %s937_s12 = int_to_ptr.vmem [resolvable:$true] %s25_s12 }
   0x4   :  { %s842_s15 = scalar_lea.hbm %s1011_s0, 128 }
   0x5   :  { %p843_p0 = scmp.ne.s32.totalorder %s1011_s0, %s842_s15  ;;  %p846_p1 = scmp.lt.u32.totalorder %s842_s15, %s1011_s0 }
   0x7   :  { %p848_p2 = pnand %p846_p1, %p843_p0 }
   0x9   :  { %851 = shalt.err (!%p848_p2)
}
   0xa   :  { %s852_s20 = scalar_lea.vmem %s17_s10, 128  ;;  %p857_p4 = scmp.lt.s32.totalorder %s17_s10, %s17_s10 }
   0xb   :  { %p853_p3 = scmp.ne.s32.totalorder %s17_s10, %s852_s20  ;;  %p858_p5 = scmp.lt.s32.totalorder %s852_s20, %s852_s20 }
   0xd   :  { %p859_p6 = por %p858_p5, %p857_p4 }
   0xf   :  { %p860_p7 = pnand %p859_p6, %p853_p3 }
  0x11   :  { %863 = shalt.err (!%p860_p7)
}
  0x12   :  { %19 = dma.hbm_to_vmem [thread:$0]  %s1011_s0, 128, %s17_s10, [#allocation3]  }
  0x13   :  { %s864_s25 = scalar_lea.hbm %s1012_s1, 3584 }
  0x14   :  { %p865_p8 = scmp.ne.s32.totalorder %s1012_s1, %s864_s25  ;;  %p868_p9 = scmp.lt.u32.totalorder %s864_s25, %s1012_s1 }
  0x16   :  { %p870_p10 = pnand %p868_p9, %p865_p8 }
  0x18   :  { %873 = shalt.err (!%p870_p10)
}
  0x19   :  { %s874_s30 = scalar_lea.vmem %s937_s12, 3584  ;;  %p879_p12 = scmp.lt.s32.totalorder %s937_s12, %s937_s12 }
  0x1a   :  { %p875_p11 = scmp.ne.s32.totalorder %s937_s12, %s874_s30  ;;  %p880_p13 = scmp.lt.s32.totalorder %s874_s30, %s874_s30 }
  0x1c   :  { %p881_p0 = por %p880_p13, %p879_p12 }
  0x1e   :  { %p882_p1 = pnand %p881_p0, %p875_p11 }
  0x20   :  { %885 = shalt.err (!%p882_p1)
}
  0x21   :  { %s916_s0 = smov 128   ;;  %s917_s3 = smov 8  }
  0x22   :  { %31 = dma.hbm_to_vmem [thread:$0]  %s1012_s1, 3584, %s937_s12, [#allocation6], %s916_s0, %s916_s0, %s917_s3  }
  0x23   :  { %908 = dma.done.wait [#allocation3], 128  }
  0x24   :  { %909 = vsyncadd [#allocation3], 4294967168 }
  0x25   :  { %910 = dma.done.wait [#allocation6], 3584  }
  0x26   :  { %911 = vsyncadd [#allocation6], 4294963712  ;;  %v918_v0 = vmov 0.0|0.0   ;;  %vm919_vm0 = vmmov 0   ;;  %v920_v1 = vmov 0.0   ;;  %v39_v2 = vld [vmem:[#allocation5] sm:$0xff] }
  0x27   :  { %788 = vmatprep.subr.bf16.mxu0 %v918_v0  ;;  %731 = vmatprep.mubr.msk.f32.mxu0 %vm919_vm0, %v920_v1  ;;  %v40_v3 = vld [vmem:[#allocation5 + $0x8] sm:$0xff]  ;;  %v41_v4 = vld [vmem:[#allocation5 + $0x10] sm:$0xff]  ;;  %v42_v6 = vld [vmem:[#allocation5 + $0x18] sm:$0xff]  ;;  %vm48_vm1 = vcmask 261120   ;;  %vm142_vm2 = vcmask 64512   ;;  %vm225_vm4 = vcmask 1043456  }
  0x28   :  { %734 = vmatprep.subr.mxu1 %v920_v1  ;;  %736 = vmatprep.mubr.msk.f32.mxu1 %vm919_vm0, %v920_v1  ;;  %v789_v5 = vpack.c.bf16 %v40_v3, %v39_v2  ;;  %v792_v7 = vpack.c.bf16 %v42_v6, %v41_v4  ;;  %v38_v8 = vld [vmem:[#allocation2] sm:$0xff]  ;;  %v136_v9 = vld [vmem:[#allocation5 + $0x28] sm:$0xff]  ;;  %v680_v10 = vld [vmem:[#allocation5 + $0x20] ss:$0 sm:$0xff]  ;;  %vm221_vm5 = vcmask 31744   ;;  %s921_s1 = smov [#allocation7]  }
  0x29   :  { %735 = vmatpush3.msra.mxu1 %v136_v9  ;;  %v220_v26 = vld [vmem:[#allocation5 + $0x58] sm:$0xf]  ;;  %v217_v29 = vld [vmem:[#allocation5 + $0x40] sm:$0xff]  ;;  %v682_v30 = vld [vmem:[#allocation5 + $0x30] ss:$0 sm:$0xff]  ;;  %s670_s6 = sshll.u32 %s921_s1, 4  ;;  %s671_s6 = int_to_ptr.vmem [resolvable:$true] %s670_s6 }
  0x2a   :  { %790 = vmatpush3.bf16.msra.mxu0 %v789_v5  ;;  %739 = vmatprep.subr.mxu1 %v920_v1  ;;  %v216_v28 = vld [vmem:[#allocation5 + $0x38] sm:$0xff]  ;;  %v218_v35 = vld [vmem:[#allocation5 + $0x48] sm:$0xff]  ;;  %v219_v36 = vld [vmem:[#allocation5 + $0x50] sm:$0xff]  ;;  %s886_s7 = scalar_lea.vmem %s671_s6, 128  ;;  %p891_p3 = scmp.lt.s32.totalorder %s671_s6, %s671_s6 }
  0x2b   :  { %791 = vmatprep.subr.bf16.mxu0 %v918_v0  ;;  %v795_v32 = vpack.c.bf16 %v217_v29, %v216_v28  ;;  %v798_v37 = vpack.c.bf16 %v219_v36, %v218_v35  ;;  %v389_v38 = vld [vmem:[#allocation5 + $0x68] sm:$0xff]  ;;  %v390_v39 = vld [vmem:[#allocation5 + $0x70] sm:$0xff]  ;;  %v391_v40 = vld [vmem:[#allocation5 + $0x78] sm:$0xff]  ;;  %p887_p2 = scmp.ne.s32.totalorder %s671_s6, %s886_s7  ;;  %p892_p4 = scmp.lt.s32.totalorder %s886_s7, %s886_s7 }
  0x2c   :  { %v801_v41 = vpack.c.bf16 %v390_v39, %v389_v38  ;;  %v392_v42 = vld [vmem:[#allocation5 + $0x80] sm:$0xff]  ;;  %v485_v2 = vld [vmem:[#allocation5 + $0x90] sm:$0xff]  ;;  %v486_v3 = vld [vmem:[#allocation5 + $0x98] sm:$0xff] }
  0x2d   :  { %v804_v43 = vpack.c.bf16 %v392_v42, %v391_v40  ;;  %v687_v47 = vld [vmem:[#allocation5 + $0x60] ss:$0 sm:$0xff]  ;;  %v807_v4 = vpack.c.bf16 %v486_v3, %v485_v2  ;;  %v488_v6 = vld [vmem:[#allocation5 + $0xa8] sm:$0xff]  ;;  %v584_v28 = vld [vmem:[#allocation5 + $0xd0] sm:$0xff]  ;;  %p893_p5 = por %p892_p4, %p891_p3 }
  0x2e   :  { %793 = vmatpush3.bf16.msra.mxu0 %v792_v7  ;;  %v487_v5 = vld [vmem:[#allocation5 + $0xa0] sm:$0xff] }
  0x2f   :  { %800 = vmatprep.subr.bf16.mxu0 %v918_v0  ;;  %v810_v7 = vpack.c.bf16 %v488_v6, %v487_v5  ;;  %p894_p6 = pnand %p893_p5, %p887_p2 }
  0x31   :  { %732 = vmatmul.mubr.msk.f32.vlgmr.msra.gmra.mrb[0].mxu0 %vm48_vm1, %v38_v8 }
  0x32   :  { %763 = vmatprep.mubr.msk.f32.mxu0 %vm919_vm0, %v920_v1  ;;  %802 = vmatpush3.bf16.msra.mxu0 %v801_v41 }
  0x33   :  { %803 = vmatprep.subr.bf16.mxu0 %v918_v0 }
  0x36   :  { %805 = vmatpush3.bf16.msra.mxu0 %v804_v43 }
  0x37   :  { %812 = vmatprep.subr.bf16.mxu0 %v918_v0 }
 0x104   :  { %v118_v11 = vpop.f32.mrb[0].mxu0 }
 0x105   :  { %v119_v12 = vadd.f32 %v680_v10, %v118_v11  ;;  %v733_v13 = vpop.f32.mrb[1].mxu0 }
 0x107   :  { %v122_v14 = vmin.f32 %v119_v12, 20.0  ;;  %vm132_vm3 = vcmp.gt.f32.partialorder %v119_v12, 20.0 }
 0x109   :  { %v123_v15 = vmul.f32 1.442695, %v122_v14 }
 0x10b   :  { %826 = vpow2.f32 %v123_v15 }
 0x115   :  { %v827_v16 = vpop.eup %826 }
 0x116   :  { %v125_v17 = vadd.f32 2.0, %v827_v16 }
 0x118   :  { %v126_v18 = vmul.f32 %v827_v16, %v125_v17 }
 0x11a   :  { %v127_v19 = vadd.f32 2.0, %v126_v18  ;;  %v133_v23 = vmul.f32 %v126_v18, %v119_v12 }
 0x11c   :  { %828 = vrcp.f32 %v127_v19 }
 0x126   :  { %v829_v20 = vpop.eup %828 }
 0x127   :  { %v129_v21 = vmul.f32 %v829_v20, %v127_v19 }
 0x129   :  { %v130_v22 = vsub.f32 2.0, %v129_v21 }
 0x12b   :  { %v131_v24 = vmul.f32 %v829_v20, %v130_v22 }
 0x12d   :  { %v134_v25 = vmul.f32 %v133_v23, %v131_v24  ;;  %v581_v24 = vld [vmem:[#allocation5 + $0xb8] sm:$0xff] }
 0x12f   :  { %v135_v27 = vsel %vm132_vm3, %v119_v12, %v134_v25  ;;  %v582_v25 = vld [vmem:[#allocation5 + $0xc0] sm:$0xff] }
 0x130   :  { %737 = vmatmul.mubr.msk.f32.vlgmr.msra.gmra.mrb[0].mxu1 %vm142_vm2, %v135_v27  ;;  %v583_v27 = vld [vmem:[#allocation5 + $0xc8] sm:$0xff] }
 0x131   :  { %740 = vmatpush3.msk.msra.mxu1 %vm225_vm4, %v220_v26  ;;  %741 = vmatprep.mubr.msk.f32.mxu1 %vm919_vm0, %v920_v1  ;;  %v813_v26 = vpack.c.bf16 %v582_v25, %v581_v24  ;;  %v816_v29 = vpack.c.bf16 %v584_v28, %v583_v27 }
 0x132   :  { %794 = vmatprep.subr.bf16.mxu1 %v918_v0 }
 0x203   :  { %v212_v31 = vpop.f32.mrb[0].mxu1 }
 0x204   :  { %v213_v33 = vadd.f32 %v682_v30, %v212_v31  ;;  %v738_v34 = vpop.f32.mrb[1].mxu1  ;;  %v690_v30 = vld [vmem:[#allocation5 + $0xb0] ss:$0 sm:$0xff] }
 0x206   :  { %742 = vmatmul.mubr.msk.f32.vlgmr.msra.gmra.mrb[2].mxu1 %vm221_vm5, %v213_v33 }
 0x207   :  { %796 = vmatpush3.bf16.msra.mxu1 %v795_v32  ;;  %752 = vmatprep.mubr.msk.f32.mxu1 %vm919_vm0, %v920_v1 }
 0x208   :  { %797 = vmatprep.subr.bf16.mxu1 %v918_v0 }
 0x20b   :  { %799 = vmatpush3.bf16.msra.mxu1 %v798_v37 }
 0x20c   :  { %806 = vmatprep.subr.bf16.mxu1 %v918_v0 }
 0x20e   :  { %753 = vmatmul.mubr.msk.f32.vlgmr.msra.gmra.mrb[4].mxu1 %vm48_vm1, %v38_v8  ;;  %v688_v8 = vld [vmem:[#allocation5 + $0x88] ss:$0 sm:$0xff] }
 0x20f   :  { %774 = vmatprep.mubr.msk.f32.mxu1 %vm919_vm0, %v920_v1  ;;  %808 = vmatpush3.bf16.msra.mxu1 %v807_v4 }
 0x210   :  { %809 = vmatprep.subr.bf16.mxu1 %v918_v0 }
 0x213   :  { %811 = vmatpush3.bf16.msra.mxu1 %v810_v7 }
 0x2d9   :  { %v295_v44 = vpop.f32.mrb[2].mxu1 }
 0x2da   :  { %v743_v45 = vpop.f32.mrb[3].mxu1 }
 0x2e1   :  { %v365_v46 = vpop.f32.mrb[4].mxu1 }
 0x2e2   :  { %v366_v48 = vadd.f32 %v365_v46, %v295_v44  ;;  %v754_v49 = vpop.f32.mrb[5].mxu1  ;;  %v692_v46 = vld [vmem:[#allocation5 + $0xd8] ss:$0 sm:$0xff] }
 0x2e4   :  { %v374_v50 = vadd.f32 %v687_v47, %v366_v48 }
 0x2e6   :  { %v375_v51 = vmin.f32 %v374_v50, 20.0  ;;  %vm385_vm6 = vcmp.gt.f32.partialorder %v374_v50, 20.0 }
 0x2e8   :  { %v376_v52 = vmul.f32 1.442695, %v375_v51 }
 0x2ea   :  { %830 = vpow2.f32 %v376_v52 }
 0x2f4   :  { %v831_v53 = vpop.eup %830 }
 0x2f5   :  { %v378_v54 = vadd.f32 2.0, %v831_v53 }
 0x2f7   :  { %v379_v55 = vmul.f32 %v831_v53, %v378_v54 }
 0x2f9   :  { %v380_v56 = vadd.f32 2.0, %v379_v55  ;;  %v386_v60 = vmul.f32 %v379_v55, %v374_v50 }
 0x2fb   :  { %832 = vrcp.f32 %v380_v56 }
 0x305   :  { %v833_v57 = vpop.eup %832 }
 0x306   :  { %v382_v58 = vmul.f32 %v833_v57, %v380_v56 }
 0x308   :  { %v383_v59 = vsub.f32 2.0, %v382_v58 }
 0x30a   :  { %v384_v61 = vmul.f32 %v833_v57, %v383_v59 }
 0x30c   :  { %v387_v62 = vmul.f32 %v386_v60, %v384_v61 }
 0x30e   :  { %v388_v63 = vsel %vm385_vm6, %v374_v50, %v387_v62 }
 0x30f   :  { %764 = vmatmul.mubr.msk.f32.vlgmr.msra.gmra.mrb[2].mxu0 %vm48_vm1, %v388_v63 }
 0x310   :  { %785 = vmatprep.mubr.msk.f32.mxu0 %vm919_vm0, %v920_v1  ;;  %814 = vmatpush3.bf16.msra.mxu0 %v813_v26 }
 0x311   :  { %815 = vmatprep.subr.bf16.mxu0 %v918_v0 }
 0x314   :  { %817 = vmatpush3.bf16.msra.mxu0 %v816_v29 }
 0x3e2   :  { %v467_v9 = vpop.f32.mrb[2].mxu0 }
 0x3e3   :  { %v468_v10 = vadd.f32 %v688_v8, %v467_v9  ;;  %v765_v11 = vpop.f32.mrb[3].mxu0 }
 0x3e5   :  { %v471_v12 = vmin.f32 %v468_v10, 20.0  ;;  %vm481_vm7 = vcmp.gt.f32.partialorder %v468_v10, 20.0 }
 0x3e7   :  { %v472_v13 = vmul.f32 1.442695, %v471_v12 }
 0x3e9   :  { %834 = vpow2.f32 %v472_v13 }
 0x3f3   :  { %v835_v14 = vpop.eup %834 }
 0x3f4   :  { %v474_v15 = vadd.f32 2.0, %v835_v14 }
 0x3f6   :  { %v475_v1 = vmul.f32 %v835_v14, %v474_v15 }
 0x3f8   :  { %v476_v16 = vadd.f32 2.0, %v475_v1  ;;  %v482_v20 = vmul.f32 %v475_v1, %v468_v10 }
 0x3fa   :  { %836 = vrcp.f32 %v476_v16 }
 0x404   :  { %v837_v17 = vpop.eup %836 }
 0x405   :  { %v478_v18 = vmul.f32 %v837_v17, %v476_v16 }
 0x407   :  { %v479_v19 = vsub.f32 2.0, %v478_v18 }
 0x409   :  { %v480_v21 = vmul.f32 %v837_v17, %v479_v19 }
 0x40b   :  { %v483_v22 = vmul.f32 %v482_v20, %v480_v21 }
 0x40d   :  { %v484_v23 = vsel %vm481_vm7, %v468_v10, %v483_v22 }
 0x40e   :  { %775 = vmatmul.mubr.msk.f32.vlgmr.msra.gmra.mrb[6].mxu1 %vm48_vm1, %v484_v23 }
 0x4e1   :  { %v563_v31 = vpop.f32.mrb[6].mxu1 }
 0x4e2   :  { %v564_v32 = vadd.f32 %v690_v30, %v563_v31  ;;  %v776_v33 = vpop.f32.mrb[7].mxu1 }
 0x4e4   :  { %v567_v34 = vmin.f32 %v564_v32, 20.0  ;;  %vm577_vm8 = vcmp.gt.f32.partialorder %v564_v32, 20.0 }
 0x4e6   :  { %v568_v35 = vmul.f32 1.442695, %v567_v34 }
 0x4e8   :  { %838 = vpow2.f32 %v568_v35 }
 0x4f2   :  { %v839_v36 = vpop.eup %838 }
 0x4f3   :  { %v570_v37 = vadd.f32 2.0, %v839_v36 }
 0x4f5   :  { %v571_v38 = vmul.f32 %v839_v36, %v570_v37 }
 0x4f7   :  { %v572_v39 = vadd.f32 2.0, %v571_v38  ;;  %v578_v43 = vmul.f32 %v571_v38, %v564_v32 }
 0x4f9   :  { %840 = vrcp.f32 %v572_v39 }
 0x503   :  { %v841_v40 = vpop.eup %840 }
 0x504   :  { %v574_v41 = vmul.f32 %v841_v40, %v572_v39 }
 0x506   :  { %v575_v42 = vsub.f32 2.0, %v574_v41 }
 0x508   :  { %v576_v44 = vmul.f32 %v841_v40, %v575_v42 }
 0x50a   :  { %v579_v45 = vmul.f32 %v578_v43, %v576_v44 }
 0x50c   :  { %v580_v0 = vsel %vm577_vm8, %v564_v32, %v579_v45 }
 0x50d   :  { %786 = vmatmul.mubr.msk.f32.vlgmr.msra.gmra.mrb[4].mxu0 %vm48_vm1, %v580_v0 }
 0x5e0   :  { %v659_v47 = vpop.f32.mrb[4].mxu0 }
 0x5e1   :  { %v660_v48 = vadd.f32 %v692_v46, %v659_v47  ;;  %v787_v49 = vpop.f32.mrb[5].mxu0 }
 0x5e3   :  { %663 = vst [vmem:[#allocation7] sm:$0xff] %v660_v48 }
 0x5e4   :  { %897 = shalt.err (!%p894_p6)
}
 0x5e5   :  { %s898_s10 = scalar_lea.hbm %s1013_s2, 128 }
 0x5e6   :  { %p899_p7 = scmp.ne.s32.totalorder %s1013_s2, %s898_s10  ;;  %p902_p8 = scmp.lt.u32.totalorder %s898_s10, %s1013_s2 }
 0x5e8   :  { %p904_p9 = pnand %p902_p8, %p899_p7 }
 0x5ea   :  { %907 = shalt.err (!%p904_p9)
}
 0x5eb   :  { %673 = dma.vmem_to_hbm [thread:$0]  %s671_s6, 128, %s1013_s2, [#allocation4]  }
 0x5ec   :  { %912 = dma.done.wait [#allocation4], 128  }
 0x5ed   :  { %913 = vsyncadd [#allocation4], 4294967168 }
 0x5ee   :  { %677 = vsyncpa [#allocation3], 1 }
 0x5ef   :  { %678 = vsyncpa [#allocation6], 1 }
 0x5f0   :  { %679 = vsyncpa [#allocation4], 1 }

</bundles_post_ra>
